<compile_context>
chip_gen: v7x
topology: tpu7x:2x2x1
jax: 0.10.0
libtpu: 0.0.40
codegen_flags: <defaults>
</compile_context>

<pallas_src>
import functools

import jax
import jax.numpy as jnp
from jax.experimental import pallas as pl
from jax.experimental.pallas import tpu as pltpu

# Scaled-down config (original: feat_dim=2048, spatial 7x4 from 224x112 input).
B = 2            # batch (video clips)
T = 8            # frames per clip
FEAT = 128       # feat_dim (2048 in the original module)
H, W = 7, 4      # backbone output spatial size
NUM_CLASSES = 10

try:  # physical VMEM per core (v5e/v6e: 128 MiB, v7x: 64 MiB)
    _VMEM_CAP = int(pltpu.get_tpu_info().vmem_capacity_bytes)
except Exception:  # pragma: no cover - conservative fallback
    _VMEM_CAP = 64 * 1024 * 1024


def _pick_chunk(thw_blk, cap=64):
    """Largest 8-aligned divisor of thw_blk (<= cap); keeps chunk slices on
    sublane-tile boundaries.  Falls back to the whole block."""
    best = None
    for c in range(8, min(cap, thw_blk) + 1, 8):
        if thw_blk % c == 0:
            best = c
    return best if best is not None else thw_blk


def _accumulate_pooled(x_ref, acc_ref, *, chunk):
    """acc += sum over the THW axis of this bf16 block, chunk-wise in f32
    (no full-block f32 temp)."""
    thw_blk = x_ref.shape[1]
    acc = acc_ref[...]
    for c in range(thw_blk // chunk):
        xc = x_ref[:, c * chunk:(c + 1) * chunk, :].astype(jnp.float32)
        acc = acc + jnp.sum(xc, axis=1)
    acc_ref[...] = acc


def tp_train_kernel(x_ref, wc_ref, bc_ref, y_ref, acc_ref, *, inv_thw, chunk):
    # x_ref : (b_blk, THW_BLK, FEAT) bf16 backbone features, FEAT on lanes.
    # wc_ref: (FEAT, NC_PAD) bf16 classifier weight, N padded to 128 lanes.
    # bc_ref: (1, NC_PAD)    f32  classifier bias (padded).
    k = pl.program_id(1)

    @pl.when(k == 0)
    def _init():
        acc_ref[...] = jnp.zeros_like(acc_ref)

    _accumulate_pooled(x_ref, acc_ref, chunk=chunk)

    @pl.when(k == pl.num_programs(1) - 1)
    def _finalize():
        # avg_pool2d over (H,W) + avg_pool1d over T == mean over fused THW;
        # inv_thw is a compile-time constant from the FULL extent.
        f = (acc_ref[...] * inv_thw).astype(jnp.bfloat16)
        y_ref[...] = (jnp.dot(f, wc_ref[...], preferred_element_type=jnp.float32)
                      + bc_ref[...])


def tp_eval_kernel(x_ref, f_ref, acc_ref, *, inv_thw, chunk):
    k = pl.program_id(1)

    @pl.when(k == 0)
    def _init():
        acc_ref[...] = jnp.zeros_like(acc_ref)

    _accumulate_pooled(x_ref, acc_ref, chunk=chunk)

    @pl.when(k == pl.num_programs(1) - 1)
    def _finalize():
        f_ref[...] = acc_ref[...] * inv_thw


@functools.partial(jax.jit, static_argnames=("training",))
def resnet50tp_head(x_feat, w_cls, b_cls, *, training=True):
    """x_feat: (B, T, H, W, FEAT) backbone feature maps, channels-last
    (bf16 preferred; f32 also accepted — cast happens chunk-wise in-kernel)."""
    Bn, Tn, Hh, Ww, C = x_feat.shape
    THW = Tn * Hh * Ww
    NC = w_cls.shape[0]
    NC_PAD = pl.cdiv(NC, 128) * 128

    # Contiguous dim-merge: free view, no extra HBM pass.
    x = x_feat.reshape(Bn, THW, C)

    # Batch tiling: 8-row tiles when possible (dense sublane stores; multiple
    # "parallel" steps for v7x's two TCs at real batch sizes).  Tiny batches use
    # the full-dim escape hatch rather than padding the big array in HBM.
    b_blk = 8 if (Bn % 8 == 0) else Bn
    nb = Bn // b_blk

    # THW reduction tiling: split only if a block would exceed ~4 MiB, so the
    # double-buffered feature stream stays comfortable in v7x's 64 MiB VMEM at
    # production sizes; each split block stays a multiple of 8 sublanes.
    itemsize = jnp.dtype(x.dtype).itemsize
    budget = 4 * 1024 * 1024
    nk = 1
    while (b_blk * (THW // nk) * C * itemsize > budget
           and THW % (nk * 2) == 0 and (THW // (nk * 2)) % 8 == 0):
        nk *= 2
    THW_BLK = THW // nk
    chunk = _pick_chunk(THW_BLK)
    inv_thw = 1.0 / float(THW)          # full-extent scale, tiling-independent

    x_spec = pl.BlockSpec((b_blk, THW_BLK, C), lambda i, k: (i, k, 0))
    dims = ("parallel", "arbitrary")

    # Per-generation VMEM limit from the real footprint (double-buffered x,
    # classifier operands, outputs, accumulator), capped below physical VMEM.
    need = 2 * b_blk * THW_BLK * C * itemsize          # x, double-buffered
    need += 2 * (C * NC_PAD * 2 + NC_PAD * 4)          # wc (bf16) + bc (f32)
    need += b_blk * (NC_PAD + 2 * C) * 4               # y/f out + f32 acc
    vmem_limit = int(min(max(32 << 20, 2 * need),
                         min(_VMEM_CAP * 3 // 4, 96 << 20)))
    cparams = pltpu.CompilerParams(dimension_semantics=dims,
                                   vmem_limit_bytes=vmem_limit)

    if training:
        # Classifier in (K, N) layout, bf16, N zero-padded to 128 lanes.
        wc = jnp.zeros((C, NC_PAD), jnp.bfloat16).at[:, :NC].set(
            w_cls.T.astype(jnp.bfloat16))
        bc = jnp.zeros((1, NC_PAD), jnp.float32).at[:, :NC].set(
            b_cls.astype(jnp.float32).reshape(1, NC))
        y_pad = pl.pallas_call(
            functools.partial(tp_train_kernel, inv_thw=inv_thw, chunk=chunk),
            out_shape=jax.ShapeDtypeStruct((Bn, NC_PAD), jnp.float32),
            grid=(nb, nk),
            in_specs=[x_spec,
                      pl.BlockSpec((C, NC_PAD), lambda i, k: (0, 0)),
                      pl.BlockSpec((1, NC_PAD), lambda i, k: (0, 0))],
            out_specs=pl.BlockSpec((b_blk, NC_PAD), lambda i, k: (i, 0)),
            scratch_shapes=[pltpu.VMEM((b_blk, C), jnp.float32)],
            compiler_params=cparams,
        )(x, wc, bc)
        return y_pad[:, :NC]            # self.loss == {'xent'} -> logits only

    # Eval path: no classifier DMA, no logits store — just the pooled feature.
    f = pl.pallas_call(
        functools.partial(tp_eval_kernel, inv_thw=inv_thw, chunk=chunk),
        out_shape=jax.ShapeDtypeStruct((Bn, C), jnp.float32),
        grid=(nb, nk),
        in_specs=[x_spec],
        out_specs=pl.BlockSpec((b_blk, C), lambda i, k: (i, 0)),
        scratch_shapes=[pltpu.VMEM((b_blk, C), jnp.float32)],
        compiler_params=cparams,
    )(x)
    return f


def ref_forward(x_feat, w_cls, b_cls):
    """Pure-JAX reference of the same forward (bf16 features / bf16 classifier)."""
    x32 = x_feat.astype(jnp.float32)
    f = x32.mean(axis=(1, 2, 3))                       # pool over (T, H, W)
    fq = f.astype(jnp.bfloat16).astype(jnp.float32)
    wq = w_cls.astype(jnp.bfloat16).astype(jnp.float32)
    y = fq @ wq.T + b_cls
    return y, f


if __name__ == "__main__":
    key = jax.random.PRNGKey(0)
    kx, kw, kb = jax.random.split(key, 3)
    # Backbone feature maps (stand-in for self.base output), channels-last bf16
    # as a TPU backbone would emit them.
    x_feat = jax.random.normal(kx, (B, T, H, W, FEAT), jnp.float32).astype(jnp.bfloat16)
    # nn.Linear(feat_dim, num_classes): weight (NC, FEAT), bias (NC,)
    w_cls = 0.05 * jax.random.normal(kw, (NUM_CLASSES, FEAT), jnp.float32)
    b_cls = 0.05 * jax.random.normal(kb, (NUM_CLASSES,), jnp.float32)

    y = resnet50tp_head(x_feat, w_cls, b_cls, training=True)    # logits (xent)
    f = resnet50tp_head(x_feat, w_cls, b_cls, training=False)   # eval: feature
    jax.block_until_ready((y, f))

    y_ref, f_ref = ref_forward(x_feat, w_cls, b_cls)
    assert y.shape == (B, NUM_CLASSES) and f.shape == (B, FEAT)
    assert jnp.allclose(f, f_ref, rtol=1e-3, atol=1e-3)
    assert jnp.allclose(y, y_ref, rtol=1e-2, atol=1e-3)
    print("KERNEL_OK")
</pallas_src>

<mosaic_0001>
module attributes {stable_mosaic.version = 11 : i64} {
  func.func @tp_train_kernel(%arg0: i32, %arg1: i32, %arg2: memref<2x224x128xbf16, #tpu.memory_space<vmem>>, %arg3: memref<128x128xbf16, #tpu.memory_space<vmem>>, %arg4: memref<1x128xf32, #tpu.memory_space<vmem>>, %arg5: memref<2x128xf32, #tpu.memory_space<vmem>>, %arg6: memref<2x128xf32, #tpu.memory_space<vmem>>) attributes {dimension_semantics = [#tpu.dimension_semantics<parallel>, #tpu.dimension_semantics<arbitrary>], iteration_bounds = array<i64: 1, 1>, scalar_prefetch = 0 : i64, scratch_operands = 1 : i64, tpu.core_type = #tpu.core_type<tc>, window_params = [{transform_indices = @transform_0, window_bounds = array<i64: 2, 224, 128>}, {pipeline_mode = #tpu.pipeline_mode<synchronous>, transform_indices = @transform_1, window_bounds = array<i64: 128, 128>}, {pipeline_mode = #tpu.pipeline_mode<synchronous>, transform_indices = @transform_2, window_bounds = array<i64: 1, 128>}, {transform_indices = @transform_3, window_bounds = array<i64: 2, 128>}]} {
    %c0_i32 = arith.constant 0 : i32
    %0 = arith.cmpi eq, %arg1, %c0_i32 : i32
    %1 = arith.extui %0 : i1 to i32
    %c0_i32_0 = arith.constant 0 : i32
    %2 = arith.cmpi ne, %1, %c0_i32_0 : i32
    scf.if %2 {
      %cst_18 = arith.constant 0.000000e+00 : f32
      %24 = vector.broadcast %cst_18 : f32 to vector<2x128xf32>
      %c0_19 = arith.constant 0 : index
      %c0_20 = arith.constant 0 : index
      %25 = vector.load %arg6[%c0_19, %c0_20] : memref<2x128xf32, #tpu.memory_space<vmem>>, vector<2x128xf32>
      tpu.vector_store %arg6[%c0_19, %c0_20], %24 {strides = array<i32>} : memref<2x128xf32, #tpu.memory_space<vmem>>, vector<2x128xf32>,
    } else {
    }
    %c0 = arith.constant 0 : index
    %c0_1 = arith.constant 0 : index
    %3 = vector.load %arg6[%c0, %c0_1] : memref<2x128xf32, #tpu.memory_space<vmem>>, vector<2x128xf32>
    %c0_2 = arith.constant 0 : index
    %c0_3 = arith.constant 0 : index
    %c0_4 = arith.constant 0 : index
    %4 = vector.load %arg2[%c0_2, %c0_3, %c0_4] : memref<2x224x128xbf16, #tpu.memory_space<vmem>>, vector<2x56x128xbf16>
    %5 = arith.extf %4 : vector<2x56x128xbf16> to vector<2x56x128xf32>
    %cst = arith.constant dense<0.000000e+00> : vector<2x128xf32>
    %6 = vector.multi_reduction <add>, %5, %cst [1] : vector<2x56x128xf32> to vector<2x128xf32>
    %7 = arith.addf %3, %6 : vector<2x128xf32>
    %c0_5 = arith.constant 0 : index
    %c56 = arith.constant 56 : index
    %c0_6 = arith.constant 0 : index
    %8 = vector.load %arg2[%c0_5, %c56, %c0_6] : memref<2x224x128xbf16, #tpu.memory_space<vmem>>, vector<2x56x128xbf16>
    %9 = arith.extf %8 : vector<2x56x128xbf16> to vector<2x56x128xf32>
    %cst_7 = arith.constant dense<0.000000e+00> : vector<2x128xf32>
    %10 = vector.multi_reduction <add>, %9, %cst_7 [1] : vector<2x56x128xf32> to vector<2x128xf32>
    %11 = arith.addf %7, %10 : vector<2x128xf32>
    %c0_8 = arith.constant 0 : index
    %c112 = arith.constant 112 : index
    %c0_9 = arith.constant 0 : index
    %12 = vector.load %arg2[%c0_8, %c112, %c0_9] : memref<2x224x128xbf16, #tpu.memory_space<vmem>>, vector<2x56x128xbf16>
    %13 = arith.extf %12 : vector<2x56x128xbf16> to vector<2x56x128xf32>
    %cst_10 = arith.constant dense<0.000000e+00> : vector<2x128xf32>
    %14 = vector.multi_reduction <add>, %13, %cst_10 [1] : vector<2x56x128xf32> to vector<2x128xf32>
    %15 = arith.addf %11, %14 : vector<2x128xf32>
    %c0_11 = arith.constant 0 : index
    %c168 = arith.constant 168 : index
    %c0_12 = arith.constant 0 : index
    %16 = vector.load %arg2[%c0_11, %c168, %c0_12] : memref<2x224x128xbf16, #tpu.memory_space<vmem>>, vector<2x56x128xbf16>
    %17 = arith.extf %16 : vector<2x56x128xbf16> to vector<2x56x128xf32>
    %cst_13 = arith.constant dense<0.000000e+00> : vector<2x128xf32>
    %18 = vector.multi_reduction <add>, %17, %cst_13 [1] : vector<2x56x128xf32> to vector<2x128xf32>
    %19 = arith.addf %15, %18 : vector<2x128xf32>
    %c0_14 = arith.constant 0 : index
    %c0_15 = arith.constant 0 : index
    %20 = vector.load %arg6[%c0_14, %c0_15] : memref<2x128xf32, #tpu.memory_space<vmem>>, vector<2x128xf32>
    tpu.vector_store %arg6[%c0_14, %c0_15], %19 {strides = array<i32>} : memref<2x128xf32, #tpu.memory_space<vmem>>, vector<2x128xf32>,
    %c0_i32_16 = arith.constant 0 : i32
    %21 = arith.cmpi eq, %arg1, %c0_i32_16 : i32
    %22 = arith.extui %21 : i1 to i32
    %c0_i32_17 = arith.constant 0 : i32
    %23 = arith.cmpi ne, %22, %c0_i32_17 : i32
    scf.if %23 {
      %c0_18 = arith.constant 0 : index
      %c0_19 = arith.constant 0 : index
      %24 = vector.load %arg6[%c0_18, %c0_19] : memref<2x128xf32, #tpu.memory_space<vmem>>, vector<2x128xf32>
      %cst_20 = arith.constant 0.00446428591 : f32
      %25 = vector.broadcast %cst_20 : f32 to vector<2x128xf32>
      %26 = arith.mulf %24, %25 : vector<2x128xf32>
      %27 = arith.truncf %26 : vector<2x128xf32> to vector<2x128xbf16>
      %c0_21 = arith.constant 0 : index
      %c0_22 = arith.constant 0 : index
      %28 = vector.load %arg3[%c0_21, %c0_22] : memref<128x128xbf16, #tpu.memory_space<vmem>>, vector<128x128xbf16>
      %cst_23 = arith.constant dense<0.000000e+00> : vector<2x128xf32>
      %29 = tpu.matmul %27, %28, %cst_23 {dimension_numbers = #tpu.dot_dimension_numbers<[1], [0], [0], [1], [0, 0, 1, 1], [], []>} : vector<2x128xbf16>, vector<128x128xbf16>, vector<2x128xf32> -> vector<2x128xf32>
      %c0_24 = arith.constant 0 : index
      %c0_25 = arith.constant 0 : index
      %30 = vector.load %arg4[%c0_24, %c0_25] : memref<1x128xf32, #tpu.memory_space<vmem>>, vector<1x128xf32>
      %31 = vector.broadcast %30 : vector<1x128xf32> to vector<2x128xf32>
      %32 = arith.addf %29, %31 : vector<2x128xf32>
      %c0_26 = arith.constant 0 : index
      %c0_27 = arith.constant 0 : index
      %33 = vector.load %arg5[%c0_26, %c0_27] : memref<2x128xf32, #tpu.memory_space<vmem>>, vector<2x128xf32>
      tpu.vector_store %arg5[%c0_26, %c0_27], %32 {strides = array<i32>} : memref<2x128xf32, #tpu.memory_space<vmem>>, vector<2x128xf32>,
    } else {
    }
    return
  }
  func.func @transform_0(%arg0: i32, %arg1: i32) -> (i32, i32, i32) {
    %c0_i32 = arith.constant 0 : i32
    %c0_i32_0 = arith.constant 0 : i32
    return %arg0, %arg1, %c0_i32 : i32, i32, i32
  }
  func.func @transform_1(%arg0: i32, %arg1: i32) -> (i32, i32) {
    %c0_i32 = arith.constant 0 : i32
    %c0_i32_0 = arith.constant 0 : i32
    %c0_i32_1 = arith.constant 0 : i32
    return %c0_i32, %c0_i32_0 : i32, i32
  }
  func.func @transform_2(%arg0: i32, %arg1: i32) -> (i32, i32) {
    %c0_i32 = arith.constant 0 : i32
    %c0_i32_0 = arith.constant 0 : i32
    %c0_i32_1 = arith.constant 0 : i32
    return %c0_i32, %c0_i32_0 : i32, i32
  }
  func.func @transform_3(%arg0: i32, %arg1: i32) -> (i32, i32) {
    %c0_i32 = arith.constant 0 : i32
    %c0_i32_0 = arith.constant 0 : i32
    return %arg0, %c0_i32 : i32, i32
  }
}

</mosaic_0001>

<bundles_post_ra>
// kernel: resnet50tp_head.1
= control target key start
LH: loop header
LB: loop body
LE: loop exit
PB: predicated region body
PF: predicated region fallthrough
CT: control target
= control target key end

     0   :  { %v576_v1 = vmov 0.0   ;;  %vm577_vm0 = vmmov 0   ;;  %s744_s0 = inlined_call_operand.vmem [shape: bf16[2,224,128], index: 0, kind: input, shape index: {}]   ;;  %s745_s1 = inlined_call_operand.vmem [shape: bf16[128,128], index: 1, kind: input, shape index: {}]   ;;  %s746_s2 = inlined_call_operand.vmem [shape: f32[1,128], index: 2, kind: input, shape index: {}]   ;;  %s747_s3 = inlined_call_operand.hbm [shape: f32[2,128], index: 3, kind: output, shape index: {}]  }
   0x1   :  { %v544_v0 = vld [vmem:[%s745_s1] sm:$0xff]   ;;  %521 = vmatprep.subr.bf16.mxu0 %v576_v1  ;;  %20 = vst [vmem:[#allocation2] sm:$0x3] %v576_v1  ;;  %v545_v2 = vld [vmem:[%s745_s1 + $0x8] sm:$0xff]   ;;  %537 = vmatprep.mubr.msk.bf16.mxu0 %vm577_vm0, %v576_v1  ;;  %v546_v3 = vld [vmem:[%s745_s1 + $0x10] sm:$0xff]  }
   0x2   :  { %522 = vmatpush3.bf16.msra.mxu0 %v544_v0  ;;  %v394_v4 = vld [vmem:[%s744_s0] sm:$0xff]   ;;  %v489_v5 = vld [vmem:[%s744_s0 + $0x8] sm:$0xff]   ;;  %v491_v8 = vld [vmem:[%s744_s0 + $0x70] sm:$0xff]  }
   0x3   :  { %523 = vmatprep.subr.bf16.mxu0 %v576_v1  ;;  %v395_v6 = vunpack.c.l.bf16 %v394_v4  ;;  %v396_v7 = vunpack.c.h.bf16 %v394_v4  ;;  %v547_v9 = vld [vmem:[%s745_s1 + $0x18] sm:$0xff]   ;;  %v399_v10 = vunpack.c.l.bf16 %v489_v5  ;;  %v490_v11 = vld [vmem:[%s744_s0 + $0x10] sm:$0xff]   ;;  %v407_v12 = vunpack.c.l.bf16 %v491_v8  ;;  %v493_v16 = vld [vmem:[%s744_s0 + $0x80] sm:$0xff]  }
   0x4   :  { %v408_v13 = vunpack.c.h.bf16 %v491_v8  ;;  %v492_v14 = vld [vmem:[%s744_s0 + $0x78] sm:$0xff]   ;;  %v400_v17 = vunpack.c.h.bf16 %v489_v5  ;;  %v494_v21 = vld [vmem:[%s744_s0 + $0x20] sm:$0xff]   ;;  %v497_v22 = vld [vmem:[%s744_s0 + $0x90] sm:$0xff]   ;;  %v403_v23 = vunpack.c.l.bf16 %v490_v11  ;;  %v404_v24 = vunpack.c.h.bf16 %v490_v11 }
   0x5   :  { %v411_v15 = vunpack.c.l.bf16 %v492_v14  ;;  %v412_v18 = vunpack.c.h.bf16 %v492_v14  ;;  %v50_v19 = vadd.f32 %v396_v7, %v395_v6  ;;  %v644_v25 = vld [vmem:[%s744_s0 + $0x28] sm:$0xff]   ;;  %v548_v26 = vld [vmem:[%s745_s1 + $0x20] sm:$0xff]   ;;  %v28_v27 = vld [vmem:[%s744_s0 + $0x18] sm:$0xff]   ;;  %v415_v28 = vunpack.c.l.bf16 %v493_v16 }
   0x6   :  { %524 = vmatpush3.bf16.msra.mxu0 %v545_v2  ;;  %v62_v20 = vadd.f32 %v408_v13, %v407_v12  ;;  %v416_v29 = vunpack.c.h.bf16 %v493_v16  ;;  %v35_v30 = vld [vmem:[%s744_s0 + $0x88] sm:$0xff]   ;;  %v42_v33 = vunpack.c.l.bf16 %v28_v27  ;;  %v419_v35 = vunpack.c.l.bf16 %v494_v21  ;;  %v659_v36 = vld [vmem:[%s744_s0 + $0x30] sm:$0xff]   ;;  %v498_v38 = vld [vmem:[%s744_s0 + $0x98] sm:$0xff]  }
   0x7   :  { %525 = vmatprep.subr.bf16.mxu0 %v576_v1  ;;  %v51_v31 = vadd.f32 %v399_v10, %v50_v19  ;;  %v49_v34 = vunpack.c.l.bf16 %v35_v30  ;;  %v431_v37 = vunpack.c.l.bf16 %v497_v22  ;;  %v420_v41 = vunpack.c.h.bf16 %v494_v21  ;;  %v500_v43 = vld [vmem:[%s744_s0 + $0x38] sm:$0xff]   ;;  %v503_v48 = vld [vmem:[%s744_s0 + $0xa8] sm:$0xff]   ;;  %v499_v54 = vld [vmem:[%s744_s0 + $0xa0] sm:$0xff]  }
   0x8   :  { %v63_v32 = vadd.f32 %v411_v15, %v62_v20  ;;  %v423_v42 = vunpack.c.l.bf16 %v644_v25  ;;  %v424_v44 = vunpack.c.h.bf16 %v644_v25  ;;  %v432_v45 = vunpack.c.h.bf16 %v497_v22  ;;  %v549_v49 = vld [vmem:[%s745_s1 + $0x28] sm:$0xff]  }
   0x9   :  { %v52_v39 = vadd.f32 %v400_v17, %v51_v31  ;;  %v94_v46 = vunpack.c.h.bf16 %v28_v27  ;;  %v101_v47 = vunpack.c.h.bf16 %v35_v30  ;;  %v427_v52 = vunpack.c.l.bf16 %v659_v36 }
   0xa   :  { %526 = vmatpush3.bf16.msra.mxu0 %v546_v3  ;;  %v64_v40 = vadd.f32 %v412_v18, %v63_v32  ;;  %v435_v53 = vunpack.c.l.bf16 %v498_v38 }
   0xb   :  { %527 = vmatprep.subr.bf16.mxu0 %v576_v1  ;;  %v53_v50 = vadd.f32 %v403_v23, %v52_v39 }
   0xc   :  { %v65_v51 = vadd.f32 %v415_v28, %v64_v40 }
   0xe   :  { %528 = vmatpush3.bf16.msra.mxu0 %v547_v9 }
   0xf   :  { %529 = vmatprep.subr.bf16.mxu0 %v576_v1 }
  0x12   :  { %530 = vmatpush3.bf16.msra.mxu0 %v548_v26 }
  0x13   :  { %8 = vsyncpa [#allocation4], 0  ;;  %531 = vmatprep.subr.bf16.mxu0 %v576_v1  ;;  %v108_v55 = vadd.f32 %v419_v35, %v94_v46  ;;  %v120_v56 = vadd.f32 %v431_v37, %v101_v47  ;;  %v443_v57 = vunpack.c.l.bf16 %v500_v43  ;;  %v444_v58 = vunpack.c.h.bf16 %v500_v43  ;;  %v501_v59 = vld [vmem:[%s744_s0 + $0x40] sm:$0xff]   ;;  %v504_v60 = vld [vmem:[%s744_s0 + $0xb0] sm:$0xff]   ;;  %s578_s30 = smov [#allocation3]  }
  0x14   :  { %v54_v61 = vadd.f32 %v404_v24, %v53_v50  ;;  %v66_v62 = vadd.f32 %v416_v29, %v65_v51  ;;  %v455_v63 = vunpack.c.l.bf16 %v503_v48  ;;  %v456_v0 = vunpack.c.h.bf16 %v503_v48  ;;  %v550_v6 = vld [vmem:[%s745_s1 + $0x30] sm:$0xff]   ;;  %v502_v14 = vld [vmem:[%s744_s0 + $0x48] sm:$0xff]   ;;  %v505_v16 = vld [vmem:[%s744_s0 + $0xb8] sm:$0xff]   ;;  %s376_s4 = sshll.u32 %s578_s30, 4  ;;  %s377_s4 = int_to_ptr.vmem [resolvable:$true] %s376_s4 }
  0x15   :  { %v436_v2 = vunpack.c.h.bf16 %v498_v38  ;;  %v439_v3 = vunpack.c.l.bf16 %v499_v54  ;;  %v109_v4 = vadd.f32 %v420_v41, %v108_v55  ;;  %v121_v5 = vadd.f32 %v432_v45, %v120_v56  ;;  %v551_v25 = vld [vmem:[%s745_s1 + $0x38] sm:$0xff]   ;;  %v143_v40 = vld [vmem:[%s744_s0 + $0x50] sm:$0xff]   ;;  %v150_v41 = vld [vmem:[%s744_s0 + $0xc0] sm:$0xff]   ;;  %s552_s5 = scalar_lea.vmem %s377_s4, 32  ;;  %p557_p1 = scmp.lt.s32.totalorder %s377_s4, %s377_s4 }
  0x16   :  { %532 = vmatpush3.bf16.msra.mxu0 %v549_v49  ;;  %v55_v7 = vadd.f32 %v54_v61, %v42_v33  ;;  %v67_v8 = vadd.f32 %v66_v62, %v49_v34  ;;  %v447_v9 = vunpack.c.l.bf16 %v501_v59  ;;  %v459_v10 = vunpack.c.l.bf16 %v504_v60  ;;  %v506_v49 = vld [vmem:[%s744_s0 + $0x58] sm:$0xff]   ;;  %v507_v61 = vld [vmem:[%s744_s0 + $0x60] sm:$0xff]   ;;  %p553_p0 = scmp.ne.s32.totalorder %s377_s4, %s552_s5  ;;  %p558_p2 = scmp.lt.s32.totalorder %s552_s5, %s552_s5 }
  0x17   :  { %533 = vmatprep.subr.bf16.mxu0 %v576_v1  ;;  %v110_v11 = vadd.f32 %v423_v42, %v109_v4  ;;  %v122_v12 = vadd.f32 %v435_v53, %v121_v5  ;;  %v448_v13 = vunpack.c.h.bf16 %v501_v59  ;;  %v460_v15 = vunpack.c.h.bf16 %v504_v60 }
  0x18   :  { %v56_v17 = vrot.slane %v55_v7, 4  ;;  %v68_v18 = vrot.slane %v67_v8, 4  ;;  %v165_v19 = vadd.f32 %v444_v58, %v443_v57  ;;  %v177_v20 = vadd.f32 %v456_v0, %v455_v63  ;;  %p559_p3 = por %p558_p2, %p557_p1 }
  0x19   :  { %v428_v21 = vunpack.c.h.bf16 %v659_v36  ;;  %v440_v22 = vunpack.c.h.bf16 %v499_v54  ;;  %v111_v23 = vadd.f32 %v424_v44, %v110_v11  ;;  %v123_v24 = vadd.f32 %v436_v2, %v122_v12 }
  0x1a   :  { %534 = vmatpush3.bf16.msra.mxu0 %v550_v6  ;;  %v451_v26 = vunpack.c.l.bf16 %v502_v14  ;;  %v463_v27 = vunpack.c.l.bf16 %v505_v16  ;;  %v166_v28 = vadd.f32 %v447_v9, %v165_v19  ;;  %v178_v29 = vadd.f32 %v459_v10, %v177_v20  ;;  %v511_v20 = vld [vmem:[%s744_s0 + $0xd8] sm:$0xff]   ;;  %p560_p4 = pnand %p559_p3, %p553_p0 }
  0x1b   :  { %535 = vmatprep.subr.bf16.mxu0 %v576_v1  ;;  %v57_v30 = vadd.f32 %v56_v17, %v55_v7  ;;  %v69_v31 = vadd.f32 %v68_v18, %v67_v8  ;;  %v112_v32 = vadd.f32 %v427_v52, %v111_v23  ;;  %v124_v33 = vadd.f32 %v439_v3, %v123_v24  ;;  %v509_v52 = vld [vmem:[%s744_s0 + $0xc8] sm:$0xff]   ;;  %v510_v3 = vld [vmem:[%s744_s0 + $0xd0] sm:$0xff]  }
  0x1c   :  { %v452_v34 = vunpack.c.h.bf16 %v502_v14  ;;  %v464_v35 = vunpack.c.h.bf16 %v505_v16  ;;  %v167_v36 = vadd.f32 %v448_v13, %v166_v28  ;;  %v179_v37 = vadd.f32 %v460_v15, %v178_v29  ;;  %v508_v14 = vld [vmem:[%s744_s0 + $0x68] sm:$0xff]  }
  0x1d   :  { %v113_v38 = vadd.f32 %v428_v21, %v112_v32  ;;  %v125_v39 = vadd.f32 %v440_v22, %v124_v33  ;;  %v157_v1 = vunpack.c.l.bf16 %v143_v40  ;;  %v164_v42 = vunpack.c.l.bf16 %v150_v41 }
  0x1e   :  { %536 = vmatpush3.bf16.msra.mxu0 %v551_v25  ;;  %v168_v43 = vadd.f32 %v451_v26, %v167_v36  ;;  %v180_v44 = vadd.f32 %v463_v27, %v179_v37  ;;  %v58_v45 = vrot.slane %v57_v30, 2  ;;  %v70_v46 = vrot.slane %v69_v31, 2 }
  0x1f   :  { %v114_v47 = vrot.slane %v113_v38, 4  ;;  %v126_v48 = vrot.slane %v125_v39, 4  ;;  %v467_v57 = vunpack.c.l.bf16 %v506_v49  ;;  %v468_v60 = vunpack.c.h.bf16 %v506_v49 }
  0x20   :  { %v169_v50 = vadd.f32 %v452_v34, %v168_v43  ;;  %v181_v51 = vadd.f32 %v464_v35, %v180_v44  ;;  %v59_v58 = vadd.f32 %v58_v45, %v57_v30  ;;  %v71_v59 = vadd.f32 %v70_v46, %v69_v31  ;;  %v21_v44 = vld [vmem:[#allocation2] sm:$0x3] }
  0x21   :  { %v115_v53 = vadd.f32 %v114_v47, %v113_v38  ;;  %v127_v54 = vadd.f32 %v126_v48, %v125_v39  ;;  %v479_v62 = vunpack.c.l.bf16 %v509_v52  ;;  %v208_v4 = vunpack.c.h.bf16 %v143_v40 }
  0x22   :  { %v170_v55 = vadd.f32 %v169_v50, %v157_v1  ;;  %v182_v56 = vadd.f32 %v181_v51, %v164_v42  ;;  %v480_v6 = vunpack.c.h.bf16 %v509_v52  ;;  %v215_v7 = vunpack.c.h.bf16 %v150_v41 }
  0x23   :  { %v116_v63 = vrot.slane %v115_v53, 2  ;;  %v128_v5 = vrot.slane %v127_v54, 2  ;;  %v471_v10 = vunpack.c.l.bf16 %v507_v61  ;;  %v222_v11 = vadd.f32 %v467_v57, %v208_v4 }
  0x24   :  { %v171_v0 = vrot.slane %v170_v55, 4  ;;  %v183_v2 = vrot.slane %v182_v56, 4  ;;  %v60_v12 = vrot.slane %v59_v58, 1  ;;  %v472_v13 = vunpack.c.h.bf16 %v507_v61 }
  0x25   :  { %v483_v15 = vunpack.c.l.bf16 %v510_v3  ;;  %v234_v16 = vadd.f32 %v479_v62, %v215_v7  ;;  %v72_v17 = vrot.slane %v71_v59, 1  ;;  %v117_v18 = vadd.f32 %v116_v63, %v115_v53 }
  0x26   :  { %v172_v8 = vadd.f32 %v171_v0, %v170_v55  ;;  %v184_v9 = vadd.f32 %v183_v2, %v182_v56  ;;  %v484_v19 = vunpack.c.h.bf16 %v510_v3  ;;  %v223_v21 = vadd.f32 %v468_v60, %v222_v11 }
  0x27   :  { %v129_v22 = vadd.f32 %v128_v5, %v127_v54  ;;  %v235_v25 = vadd.f32 %v480_v6, %v234_v16  ;;  %vm76_vm1 = vcmask 1041409   ;;  %v475_v26 = vunpack.c.l.bf16 %v508_v14 }
  0x28   :  { %v173_v23 = vrot.slane %v172_v8, 2  ;;  %v185_v24 = vrot.slane %v184_v9, 2  ;;  %v224_v27 = vadd.f32 %v471_v10, %v223_v21  ;;  %v61_v28 = vadd.f32 %v60_v12, %v59_v58  ;;  %v384_v10 = vld [vmem:[%s746_s2] ss:$0 sm:$0xff] }
  0x29   :  { %v476_v29 = vunpack.c.h.bf16 %v508_v14  ;;  %v487_v30 = vunpack.c.l.bf16 %v511_v20  ;;  %v236_v31 = vadd.f32 %v483_v15, %v235_v25  ;;  %v73_v32 = vadd.f32 %v72_v17, %v71_v59 }
  0x2a   :  { %v118_v33 = vrot.slane %v117_v18, 1  ;;  %v488_v34 = vunpack.c.h.bf16 %v511_v20  ;;  %v225_v35 = vadd.f32 %v472_v13, %v224_v27  ;;  %v130_v36 = vrot.slane %v129_v22, 1 }
  0x2b   :  { %v174_v37 = vadd.f32 %v173_v23, %v172_v8  ;;  %v186_v38 = vadd.f32 %v185_v24, %v184_v9  ;;  %v237_v39 = vadd.f32 %v484_v19, %v236_v31  ;;  %v77_v1 = vsel %vm76_vm1, %v73_v32, %v61_v28 }
  0x2c   :  { %v226_v40 = vadd.f32 %v475_v26, %v225_v35  ;;  %v119_v42 = vadd.f32 %v118_v33, %v117_v18  ;;  %v131_v45 = vadd.f32 %v130_v36, %v129_v22  ;;  %v79_v51 = vadd.f32 %v77_v1, %v21_v44 }
  0x2d   :  { %v238_v41 = vadd.f32 %v487_v30, %v237_v39  ;;  %v175_v46 = vrot.slane %v174_v37, 1  ;;  %v187_v47 = vrot.slane %v186_v38, 1 }
  0x2e   :  { %v227_v43 = vadd.f32 %v476_v29, %v226_v40  ;;  %v134_v53 = vsel %vm76_vm1, %v131_v45, %v119_v42 }
  0x2f   :  { %v239_v48 = vadd.f32 %v488_v34, %v238_v41  ;;  %v176_v54 = vadd.f32 %v175_v46, %v174_v37  ;;  %v188_v55 = vadd.f32 %v187_v47, %v186_v38  ;;  %v136_v59 = vadd.f32 %v134_v53, %v79_v51 }
  0x30   :  { %v228_v49 = vrot.slane %v227_v43, 4 }
  0x31   :  { %v240_v50 = vrot.slane %v239_v48, 4  ;;  %v191_v61 = vsel %vm76_vm1, %v188_v55, %v176_v54 }
  0x32   :  { %v229_v52 = vadd.f32 %v228_v49, %v227_v43  ;;  %v193_v2 = vadd.f32 %v191_v61, %v136_v59 }
  0x33   :  { %v241_v56 = vadd.f32 %v240_v50, %v239_v48 }
  0x34   :  { %v230_v57 = vrot.slane %v229_v52, 2 }
  0x35   :  { %v242_v58 = vrot.slane %v241_v56, 2 }
  0x36   :  { %v231_v60 = vadd.f32 %v230_v57, %v229_v52 }
  0x37   :  { %v243_v62 = vadd.f32 %v242_v58, %v241_v56 }
  0x38   :  { %v232_v63 = vrot.slane %v231_v60, 1 }
  0x39   :  { %v244_v0 = vrot.slane %v243_v62, 1 }
  0x3a   :  { %v233_v3 = vadd.f32 %v232_v63, %v231_v60 }
  0x3b   :  { %v245_v4 = vadd.f32 %v244_v0, %v243_v62 }
  0x3d   :  { %v248_v5 = vsel %vm76_vm1, %v245_v4, %v233_v3 }
  0x3e   :  { %v250_v6 = vadd.f32 %v248_v5, %v193_v2 }
  0x40   :  { %251 = vst [vmem:[#allocation2] sm:$0x3] %v250_v6 }
  0x47   :  { %v255_v7 = vld [vmem:[#allocation2] sm:$0x3] }
  0x48   :  { %v256_v8 = vmul.f32 0.004464286, %v255_v7 }
  0x4a   :  { %v257_v9 = vpack.c.bf16 %v256_v8, %v256_v8 }
  0x4c   :  { %538 = vmatmul.mubr.bf16.vlgmr.msra.gmra.mrb[0].mxu0 %v257_v9 }
 0x11f   :  { %v363_v11 = vpop.f32.mrb[0].mxu0 }
 0x120   :  { %v364_v12 = vadd.f32 %v384_v10, %v363_v11  ;;  %v539_v13 = vpop.f32.mrb[1].mxu0 }
 0x121   :  { %v366_v14 = vpop.f32.mrb[2].mxu0 }
 0x122   :  { %369 = vst [vmem:[#allocation3] sm:$0x3] %v364_v12  ;;  %v540_v15 = vpop.f32.mrb[3].mxu0 }
 0x123   :  { %563 = shalt.err (!%p560_p4)
}
 0x124   :  { %s564_s2 = scalar_lea.hbm %s747_s3, 32 }
 0x125   :  { %p565_p5 = scmp.ne.s32.totalorder %s747_s3, %s564_s2  ;;  %p568_p6 = scmp.lt.u32.totalorder %s564_s2, %s747_s3 }
 0x127   :  { %p570_p7 = pnand %p568_p6, %p565_p5 }
 0x129   :  { %573 = shalt.err (!%p570_p7)
}
 0x12a   :  { %379 = dma.vmem_to_hbm [thread:$0]  %s377_s4, 32, %s747_s3, [#allocation4]  }
 0x12b   :  { %574 = dma.done.wait [#allocation4], 32  }
 0x12c   :  { %575 = vsyncadd [#allocation4], 4294967264 }
 0x12d   :  { %383 = vsyncpa [#allocation4], 1 }

</bundles_post_ra>
